<compile_context>
chip_gen: v6e
topology: v6e:2x2x1
jax: 0.10.0
libtpu: 0.0.40
codegen_flags: <defaults>
</compile_context>

<pallas_src>
import jax
import jax.numpy as jnp
from jax.experimental import pallas as pl
from jax.experimental.pallas import tpu as pltpu


def repeated_mlp_kernel(x_ref, w1_ref, b1_ref, ws_ref, bs_ref,
                        w2_ref, b2_ref, w3_ref, b3_ref, o_ref):
    # x tile is (10, tb): features on sublanes, batch on lanes (lane-dense).
    x = x_ref[...]

    # Hoist all weight / bias loads: one vld each per grid step.
    w1, b1 = w1_ref[...], b1_ref[...]      # (16, 10), (16, 1)
    ws, bs = ws_ref[...], bs_ref[...]      # (16, 16), (16, 1)
    w2, b2 = w2_ref[...], b2_ref[...]      # (16, 16), (16, 1)
    w3, b3 = w3_ref[...], b3_ref[...]      # (1, 16),  (1, 1)

    def dense_relu(w, b, h):
        y = jnp.dot(w, h, preferred_element_type=jnp.float32) + b
        return jnp.maximum(y, 0.0)

    h = dense_relu(w1, b1, x)              # linear1 + relu          (16, tb)
    h = dense_relu(ws, bs, h)              # shared_linear + relu
    h = dense_relu(ws, bs, h)              # shared_linear + relu (reused weights)
    h = dense_relu(w2, b2, h)              # linear2 + relu
    h = dense_relu(ws, bs, h)              # shared_linear + relu
    # linear3 (no activation): (1,16) @ (16,tb) -> lane-dense (1, tb)
    o_ref[...] = (jnp.dot(w3, h, preferred_element_type=jnp.float32)
                  + b3).astype(o_ref.dtype)


def repeated_mlp(x, params, *, tb=1024):
    """x: (B, 10) float32.  params: PyTorch-oriented weights/biases (see init)."""
    B, D_in = x.shape
    assert D_in == 10
    w1, b1 = params["w1"], params["b1"]    # (16, 10), (16, 1)
    ws, bs = params["ws"], params["bs"]    # (16, 16), (16, 1)
    w2, b2 = params["w2"], params["b2"]    # (16, 16), (16, 1)
    w3, b3 = params["w3"], params["b3"]    # (1, 16),  (1, 1)

    # Feature-major: batch on the lane (last) axis.  Wrapper-side transpose is
    # pure layout plumbing; the kernel itself stays lane-dense everywhere.
    xT = x.T                               # (10, B)

    if B <= tb:
        tb_eff = B                         # full-extent block: always legal
    else:
        assert tb % 128 == 0, "batch tile must be a multiple of 128 when tiling"
        tb_eff = tb
    grid = (pl.cdiv(B, tb_eff),)

    def full(a):
        return pl.BlockSpec(a.shape, lambda i: (0,) * a.ndim)

    outT = pl.pallas_call(
        repeated_mlp_kernel,
        out_shape=jax.ShapeDtypeStruct((1, B), x.dtype),
        grid_spec=pltpu.PrefetchScalarGridSpec(
            num_scalar_prefetch=0,
            grid=grid,
            in_specs=[
                pl.BlockSpec((D_in, tb_eff), lambda i: (0, i)),  # x tile over batch lanes
                full(w1), full(b1),
                full(ws), full(bs),
                full(w2), full(b2),
                full(w3), full(b3),
            ],
            out_specs=pl.BlockSpec((1, tb_eff), lambda i: (0, i)),
        ),
        compiler_params=pltpu.CompilerParams(
            dimension_semantics=("parallel",)),
    )(xT, w1, b1, ws, bs, w2, b2, w3, b3)

    return outT.T                          # (B, 1)


def init_params(key):
    """Deterministic PyTorch-like uniform(-1/sqrt(fan_in), +1/sqrt(fan_in)) init.

    Weights stored in PyTorch orientation (out_features, in_features); biases
    as (out_features, 1) columns so they broadcast over the lane (batch) axis.
    """
    def linear(key, fan_in, fan_out):
        kw, kb = jax.random.split(key)
        bound = 1.0 / jnp.sqrt(float(fan_in))
        w = jax.random.uniform(kw, (fan_out, fan_in), jnp.float32, -bound, bound)
        b = jax.random.uniform(kb, (fan_out, 1), jnp.float32, -bound, bound)
        return w, b

    k1, k2, k3, k4 = jax.random.split(key, 4)
    w1, b1 = linear(k1, 10, 16)
    ws, bs = linear(k2, 16, 16)
    w2, b2 = linear(k3, 16, 16)
    w3, b3 = linear(k4, 16, 1)
    return dict(w1=w1, b1=b1, ws=ws, bs=bs, w2=w2, b2=b2, w3=w3, b3=b3)


def repeated_mlp_ref(x, p):
    relu = lambda v: jnp.maximum(v, 0.0)
    h = relu(x @ p["w1"].T + p["b1"].T)
    h = relu(h @ p["ws"].T + p["bs"].T)
    h = relu(h @ p["ws"].T + p["bs"].T)
    h = relu(h @ p["w2"].T + p["b2"].T)
    h = relu(h @ p["ws"].T + p["bs"].T)
    return h @ p["w3"].T + p["b3"].T


if __name__ == "__main__":
    key = jax.random.PRNGKey(0)
    k_param, k_x = jax.random.split(key)

    # B=2048 with tb=1024 -> 2-step "parallel" grid (keeps both v7x TCs busy).
    B = 2048
    x = jax.random.normal(k_x, (B, 10), jnp.float32)
    params = init_params(k_param)

    out = repeated_mlp(x, params, tb=1024)
    jax.block_until_ready(out)

    ref = repeated_mlp_ref(x, params)
    assert out.shape == (B, 1)
    assert jnp.allclose(out, ref, atol=1e-5, rtol=1e-5), "mismatch vs reference"

    print("KERNEL_OK")
</pallas_src>

<mosaic_0001>
module attributes {stable_mosaic.version = 11 : i64} {
  func.func @repeated_mlp_kernel(%arg0: i32, %arg1: memref<10x1024xf32, #tpu.memory_space<vmem>>, %arg2: memref<16x10xf32, #tpu.memory_space<vmem>>, %arg3: memref<16x1xf32, #tpu.memory_space<vmem>>, %arg4: memref<16x16xf32, #tpu.memory_space<vmem>>, %arg5: memref<16x1xf32, #tpu.memory_space<vmem>>, %arg6: memref<16x16xf32, #tpu.memory_space<vmem>>, %arg7: memref<16x1xf32, #tpu.memory_space<vmem>>, %arg8: memref<1x16xf32, #tpu.memory_space<vmem>>, %arg9: memref<1x1xf32, #tpu.memory_space<vmem>>, %arg10: memref<1x1024xf32, #tpu.memory_space<vmem>>) attributes {dimension_semantics = [#tpu.dimension_semantics<parallel>], iteration_bounds = array<i64: 2>, scalar_prefetch = 0 : i64, scratch_operands = 0 : i64, tpu.core_type = #tpu.core_type<tc>, window_params = [{transform_indices = @transform_0, window_bounds = array<i64: 10, 1024>}, {pipeline_mode = #tpu.pipeline_mode<synchronous>, transform_indices = @transform_1, window_bounds = array<i64: 16, 10>}, {pipeline_mode = #tpu.pipeline_mode<synchronous>, transform_indices = @transform_2, window_bounds = array<i64: 16, 1>}, {pipeline_mode = #tpu.pipeline_mode<synchronous>, transform_indices = @transform_3, window_bounds = array<i64: 16, 16>}, {pipeline_mode = #tpu.pipeline_mode<synchronous>, transform_indices = @transform_4, window_bounds = array<i64: 16, 1>}, {pipeline_mode = #tpu.pipeline_mode<synchronous>, transform_indices = @transform_5, window_bounds = array<i64: 16, 16>}, {pipeline_mode = #tpu.pipeline_mode<synchronous>, transform_indices = @transform_6, window_bounds = array<i64: 16, 1>}, {pipeline_mode = #tpu.pipeline_mode<synchronous>, transform_indices = @transform_7, window_bounds = array<i64: 1, 16>}, {pipeline_mode = #tpu.pipeline_mode<synchronous>, transform_indices = @transform_8, window_bounds = array<i64: 1, 1>}, {transform_indices = @transform_9, window_bounds = array<i64: 1, 1024>}]} {
    %c0 = arith.constant 0 : index
    %c0_0 = arith.constant 0 : index
    %0 = vector.load %arg1[%c0, %c0_0] : memref<10x1024xf32, #tpu.memory_space<vmem>>, vector<10x1024xf32>
    %c0_1 = arith.constant 0 : index
    %c0_2 = arith.constant 0 : index
    %1 = vector.load %arg2[%c0_1, %c0_2] : memref<16x10xf32, #tpu.memory_space<vmem>>, vector<16x10xf32>
    %c0_3 = arith.constant 0 : index
    %c0_4 = arith.constant 0 : index
    %2 = vector.load %arg3[%c0_3, %c0_4] : memref<16x1xf32, #tpu.memory_space<vmem>>, vector<16x1xf32>
    %c0_5 = arith.constant 0 : index
    %c0_6 = arith.constant 0 : index
    %3 = vector.load %arg4[%c0_5, %c0_6] : memref<16x16xf32, #tpu.memory_space<vmem>>, vector<16x16xf32>
    %c0_7 = arith.constant 0 : index
    %c0_8 = arith.constant 0 : index
    %4 = vector.load %arg5[%c0_7, %c0_8] : memref<16x1xf32, #tpu.memory_space<vmem>>, vector<16x1xf32>
    %c0_9 = arith.constant 0 : index
    %c0_10 = arith.constant 0 : index
    %5 = vector.load %arg6[%c0_9, %c0_10] : memref<16x16xf32, #tpu.memory_space<vmem>>, vector<16x16xf32>
    %c0_11 = arith.constant 0 : index
    %c0_12 = arith.constant 0 : index
    %6 = vector.load %arg7[%c0_11, %c0_12] : memref<16x1xf32, #tpu.memory_space<vmem>>, vector<16x1xf32>
    %c0_13 = arith.constant 0 : index
    %c0_14 = arith.constant 0 : index
    %7 = vector.load %arg8[%c0_13, %c0_14] : memref<1x16xf32, #tpu.memory_space<vmem>>, vector<1x16xf32>
    %c0_15 = arith.constant 0 : index
    %c0_16 = arith.constant 0 : index
    %8 = vector.load %arg9[%c0_15, %c0_16] : memref<1x1xf32, #tpu.memory_space<vmem>>, vector<1x1xf32>
    %cst = arith.constant dense<0.000000e+00> : vector<16x1024xf32>
    %9 = tpu.matmul %1, %0, %cst {dimension_numbers = #tpu.dot_dimension_numbers<[1], [0], [0], [1], [0, 0, 1, 1], [], []>} : vector<16x10xf32>, vector<10x1024xf32>, vector<16x1024xf32> -> vector<16x1024xf32>
    %10 = vector.broadcast %2 : vector<16x1xf32> to vector<16x1024xf32>
    %11 = arith.addf %9, %10 : vector<16x1024xf32>
    %cst_17 = arith.constant 0.000000e+00 : f32
    %12 = vector.broadcast %cst_17 : f32 to vector<16x1024xf32>
    %13 = arith.maximumf %11, %12 : vector<16x1024xf32>
    %cst_18 = arith.constant dense<0.000000e+00> : vector<16x1024xf32>
    %14 = tpu.matmul %3, %13, %cst_18 {dimension_numbers = #tpu.dot_dimension_numbers<[1], [0], [0], [1], [0, 0, 1, 1], [], []>} : vector<16x16xf32>, vector<16x1024xf32>, vector<16x1024xf32> -> vector<16x1024xf32>
    %15 = vector.broadcast %4 : vector<16x1xf32> to vector<16x1024xf32>
    %16 = arith.addf %14, %15 : vector<16x1024xf32>
    %cst_19 = arith.constant 0.000000e+00 : f32
    %17 = vector.broadcast %cst_19 : f32 to vector<16x1024xf32>
    %18 = arith.maximumf %16, %17 : vector<16x1024xf32>
    %cst_20 = arith.constant dense<0.000000e+00> : vector<16x1024xf32>
    %19 = tpu.matmul %3, %18, %cst_20 {dimension_numbers = #tpu.dot_dimension_numbers<[1], [0], [0], [1], [0, 0, 1, 1], [], []>} : vector<16x16xf32>, vector<16x1024xf32>, vector<16x1024xf32> -> vector<16x1024xf32>
    %20 = vector.broadcast %4 : vector<16x1xf32> to vector<16x1024xf32>
    %21 = arith.addf %19, %20 : vector<16x1024xf32>
    %cst_21 = arith.constant 0.000000e+00 : f32
    %22 = vector.broadcast %cst_21 : f32 to vector<16x1024xf32>
    %23 = arith.maximumf %21, %22 : vector<16x1024xf32>
    %cst_22 = arith.constant dense<0.000000e+00> : vector<16x1024xf32>
    %24 = tpu.matmul %5, %23, %cst_22 {dimension_numbers = #tpu.dot_dimension_numbers<[1], [0], [0], [1], [0, 0, 1, 1], [], []>} : vector<16x16xf32>, vector<16x1024xf32>, vector<16x1024xf32> -> vector<16x1024xf32>
    %25 = vector.broadcast %6 : vector<16x1xf32> to vector<16x1024xf32>
    %26 = arith.addf %24, %25 : vector<16x1024xf32>
    %cst_23 = arith.constant 0.000000e+00 : f32
    %27 = vector.broadcast %cst_23 : f32 to vector<16x1024xf32>
    %28 = arith.maximumf %26, %27 : vector<16x1024xf32>
    %cst_24 = arith.constant dense<0.000000e+00> : vector<16x1024xf32>
    %29 = tpu.matmul %3, %28, %cst_24 {dimension_numbers = #tpu.dot_dimension_numbers<[1], [0], [0], [1], [0, 0, 1, 1], [], []>} : vector<16x16xf32>, vector<16x1024xf32>, vector<16x1024xf32> -> vector<16x1024xf32>
    %30 = vector.broadcast %4 : vector<16x1xf32> to vector<16x1024xf32>
    %31 = arith.addf %29, %30 : vector<16x1024xf32>
    %cst_25 = arith.constant 0.000000e+00 : f32
    %32 = vector.broadcast %cst_25 : f32 to vector<16x1024xf32>
    %33 = arith.maximumf %31, %32 : vector<16x1024xf32>
    %cst_26 = arith.constant dense<0.000000e+00> : vector<1x1024xf32>
    %34 = tpu.matmul %7, %33, %cst_26 {dimension_numbers = #tpu.dot_dimension_numbers<[1], [0], [0], [1], [0, 0, 1, 1], [], []>} : vector<1x16xf32>, vector<16x1024xf32>, vector<1x1024xf32> -> vector<1x1024xf32>
    %35 = vector.broadcast %8 : vector<1x1xf32> to vector<1x1024xf32>
    %36 = arith.addf %34, %35 : vector<1x1024xf32>
    %c0_27 = arith.constant 0 : index
    %c0_28 = arith.constant 0 : index
    %37 = vector.load %arg10[%c0_27, %c0_28] : memref<1x1024xf32, #tpu.memory_space<vmem>>, vector<1x1024xf32>
    tpu.vector_store %arg10[%c0_27, %c0_28], %36 {strides = array<i32>} : memref<1x1024xf32, #tpu.memory_space<vmem>>, vector<1x1024xf32>,
    return
  }
  func.func @transform_0(%arg0: i32) -> (i32, i32) {
    %c0_i32 = arith.constant 0 : i32
    %c0_i32_0 = arith.constant 0 : i32
    return %c0_i32, %arg0 : i32, i32
  }
  func.func @transform_1(%arg0: i32) -> (i32, i32) {
    %c0_i32 = arith.constant 0 : i32
    %c0_i32_0 = arith.constant 0 : i32
    %c0_i32_1 = arith.constant 0 : i32
    return %c0_i32, %c0_i32_0 : i32, i32
  }
  func.func @transform_2(%arg0: i32) -> (i32, i32) {
    %c0_i32 = arith.constant 0 : i32
    %c0_i32_0 = arith.constant 0 : i32
    %c0_i32_1 = arith.constant 0 : i32
    return %c0_i32, %c0_i32_0 : i32, i32
  }
  func.func @transform_3(%arg0: i32) -> (i32, i32) {
    %c0_i32 = arith.constant 0 : i32
    %c0_i32_0 = arith.constant 0 : i32
    %c0_i32_1 = arith.constant 0 : i32
    return %c0_i32, %c0_i32_0 : i32, i32
  }
  func.func @transform_4(%arg0: i32) -> (i32, i32) {
    %c0_i32 = arith.constant 0 : i32
    %c0_i32_0 = arith.constant 0 : i32
    %c0_i32_1 = arith.constant 0 : i32
    return %c0_i32, %c0_i32_0 : i32, i32
  }
  func.func @transform_5(%arg0: i32) -> (i32, i32) {
    %c0_i32 = arith.constant 0 : i32
    %c0_i32_0 = arith.constant 0 : i32
    %c0_i32_1 = arith.constant 0 : i32
    return %c0_i32, %c0_i32_0 : i32, i32
  }
  func.func @transform_6(%arg0: i32) -> (i32, i32) {
    %c0_i32 = arith.constant 0 : i32
    %c0_i32_0 = arith.constant 0 : i32
    %c0_i32_1 = arith.constant 0 : i32
    return %c0_i32, %c0_i32_0 : i32, i32
  }
  func.func @transform_7(%arg0: i32) -> (i32, i32) {
    %c0_i32 = arith.constant 0 : i32
    %c0_i32_0 = arith.constant 0 : i32
    %c0_i32_1 = arith.constant 0 : i32
    return %c0_i32, %c0_i32_0 : i32, i32
  }
  func.func @transform_8(%arg0: i32) -> (i32, i32) {
    %c0_i32 = arith.constant 0 : i32
    %c0_i32_0 = arith.constant 0 : i32
    %c0_i32_1 = arith.constant 0 : i32
    return %c0_i32, %c0_i32_0 : i32, i32
  }
  func.func @transform_9(%arg0: i32) -> (i32, i32) {
    %c0_i32 = arith.constant 0 : i32
    %c0_i32_0 = arith.constant 0 : i32
    return %c0_i32, %arg0 : i32, i32
  }
}

</mosaic_0001>

<bundles_post_ra>
// kernel: tpu_custom_call.1
= control target key start
LH: loop header
LB: loop body
LE: loop exit
PB: predicated region body
PF: predicated region fallthrough
CT: control target
= control target key end

     0   :  { %s3173_s0 = inlined_call_operand.hbm [shape: f32[10,2048], index: 0, kind: input, shape index: {}]   ;;  %s3174_s1 = inlined_call_operand.vmem [shape: f32[16,10], index: 1, kind: input, shape index: {}]   ;;  %s3175_s2 = inlined_call_operand.vmem [shape: f32[16,1], index: 2, kind: input, shape index: {}]   ;;  %s3176_s3 = inlined_call_operand.vmem [shape: f32[16,16], index: 3, kind: input, shape index: {}]   ;;  %s3177_s4 = inlined_call_operand.vmem [shape: f32[16,1], index: 4, kind: input, shape index: {}]   ;;  %s3178_s5 = inlined_call_operand.vmem [shape: f32[16,16], index: 5, kind: input, shape index: {}]   ;;  %s3179_s6 = inlined_call_operand.vmem [shape: f32[16,1], index: 6, kind: input, shape index: {}]   ;;  %s3180_s7 = inlined_call_operand.vmem [shape: f32[1,16], index: 7, kind: input, shape index: {}]   ;;  %s3181_s8 = inlined_call_operand.<no memory space> [shape: f32[1,1], index: 8, kind: input, shape index: {}]   ;;  %s3182_s9 = inlined_call_operand.hbm [shape: f32[1,2048], index: 9, kind: output, shape index: {}]  }
   0x1   :  { %v14_v0 = vstv %s3181_s8 }
   0x2   :  { %15 = vst [vmem:[#allocation2] sm:$0x1] %v14_v0 }
   0x3   :  { %16 = vsyncpa [#allocation4], 0 }
   0x4   :  { %18 = vsyncpa [#allocation4 + $0x1], 0 }
   0x5   :  { %19 = vsyncpa [#allocation5], 0 }
   0x6   :  { %21 = vsyncpa [#allocation5 + $0x1], 0  ;;  %s2797_s11 = smov 0   ;;  %s2799_s12 = smov 0  }
   0x7   :  { %s2801_s13 = smov 0   ;;  %s2803_s14 = smov 0  }
   0x8 LB: > { %s2818_s8 = sadd.s32 4294967295, %s2734_s14   ;;  %s2520_s15 = sadd.s32 4294967294, %s2734_s14   ;;  %s2734_s14 = sphi %s2803_s14, %s3200_s14   ;;  %s2730_s13 = sphi %s2801_s13, %s3199_s13   ;;  %s2726_s12 = sphi %s2799_s12, %s3198_s12   ;;  %s2722_s11 = sphi %s2797_s11, %s3197_s11  }
   0x9   : > { %s2822_s16 = sadd.s32 1, %s2734_s14   ;;  %s34_s17 = sadd.s32 1, %s2730_s13 }
   0xa   : > { %s31_s18 = ssub.s32 %s2734_s14, %s2822_s16  ;;  %p41_p0 = scmp.ne.s32.totalorder %s2730_s13, %s2726_s12 }
   0xb   : > { %p32_p1 = scmp.eq.s32.totalorder %s31_s18, 0  ;;  %p42_p2 = scmp.eq.s32.totalorder %s2734_s14, 0 }
   0xc   : > { %p47_p3 = scmp.ne.s32.totalorder %s2726_s12, %s2722_s11  ;;  %p48_p4 = scmp.eq.s32.totalorder %s2818_s8, 0 }
   0xd   : > { %s2834_s19 = scalar_select %p32_p1, %s2730_s13, %s34_s17  }
   0xe   : > { %p2836_p5 = por %p42_p2, %p41_p0  ;;  %p2840_p6 = por %p48_p4, %p47_p3 }
   0xf   : > { %3185 = sst [smem:[#allocation9_spill]] %s2834_s19  ;;  %p239_p7 = scmp.eq.s32.totalorder %s2818_s8, 1 }
  0x10   : > { %s3187_s21 = scalar_select %p2840_p6, 1, 0 }
  0x11   : > { %p245_p8 = scmp.eq.s32.totalorder %s2520_s15, 1  ;;  %p2600_p10 = scmp.lt.s32.totalorder %s2734_s14, 2 }
  0x12   : > { %p2847_p11 = por %p239_p7, %p41_p0  ;;  %s289_s24 = sand.u32 1, %s2730_s13  }
  0x13   : > { %p2851_p12 = por %p245_p8, %p47_p3  ;;  %s2586_s25 = sshll.u32 %s2734_s14, 10 }
  0x14   : > { %s3188_s22 = scalar_select %p2847_p11, 1, 0 }
  0x15   : > { %s3189_s23 = scalar_select %p2851_p12, 1, 0 }
  0x16   : > { %s2523_s26 = sshll.u32 %s289_s24, 7  ;;  %s2860_s29 = scalar_lea.hbm %s3173_s0, %s2586_s25 }
  0x17   : > { %s293_s30 = scalar_lea.vmem [#allocation3], %s2523_s26  ;;  %p2864_p13 = pnand %p2600_p10, %p2836_p5 }
  0x18   : > { %s300_s10 = sshll.u32 %s293_s30, 4  ;;  %s2871_s17 = scalar_lea.sflag [#allocation4], %s289_s24  ;;  %s2868_s10 = int_to_ptr.vmem [resolvable:$true] %s300_s10 }
  0x19   : > { %s2642_s18 = scalar_lea.hbm %s2860_s29, 2048  ;;  %p2644_p2 = pneg %p2864_p13 }
  0x1a   : > { %p2643_p1 = scmp.ne.s32.totalorder %s2860_s29, %s2642_s18  ;;  %s2647_s20 = scalar_lea.hbm %s3173_s0, 4096 }
  0x1b   : > { %p2648_p5 = scmp.lt.s32.totalorder %s2860_s29, %s3173_s0  ;;  %p2649_p7 = scmp.lt.s32.totalorder %s2647_s20, %s2642_s18 }
  0x1c   : > { %p2645_p3 = pnand %p2644_p2, %p2643_p1 }
  0x1d   : > { %p2650_p8 = por %p2649_p7, %p2648_p5 }
  0x1e   : > { %p2646_p4 = pneg %p2645_p3 }
  0x20   : > { %p2651_p10 = pnand %p2650_p8, %p2646_p4 }
  0x22   : > { %2654 = shalt.err (!%p2651_p10)
}
  0x23   : > { %s2655_s24 = scalar_lea.vmem %s2868_s10, 2048  ;;  %s2736_s30 = smov [#allocation3]  }
  0x24   : > { %p2656_p9 = scmp.ne.s32.totalorder %s2868_s10, %s2655_s24  ;;  %s2660_s19 = sshll.u32 %s2736_s30, 4  ;;  %s2661_s19 = int_to_ptr.vmem [resolvable:$false] %s2660_s19 }
  0x25   : > { %s2662_s25 = scalar_lea.vmem %s2661_s19, 4096  ;;  %p2663_p3 = scmp.lt.s32.totalorder %s2868_s10, %s2661_s19 }
  0x26   : > { %p2658_p0 = pnand %p2656_p9, %p2644_p2  ;;  %p2664_p12 = scmp.lt.s32.totalorder %s2662_s25, %s2655_s24 }
  0x28   : > { %p2659_p1 = pneg %p2658_p0  ;;  %p2665_p11 = por %p2664_p12, %p2663_p3 }
  0x2a   : > { %p2666_p6 = pnand %p2665_p11, %p2659_p1 }
  0x2c   : > { %2669 = shalt.err (!%p2666_p6)
}
  0x2d   : > { %s2737_s18 = smov 2048   ;;  %s2738_s26 = smov 1024  }
  0x2e   : > { %s2739_s20 = smov 64   ;;  %p308_p9 = scmp.lt.s32.totalorder %s2734_s14, 3 }
  0x2f   : > { %2595 = dma.hbm_to_vmem [thread:$0]  (!%p2864_p13), %s2860_s29, 2048, %s2868_s10, %s2871_s17, %s2737_s18, %s2738_s26, %s2739_s20  }
  0x30   : > { %p3191_p0 = scmp.ge.s32.totalorder %s2734_s14, 1 }
  0x32   : > { %p309_p2 = pnand %p3191_p0, %p308_p9 }
  0x33   : > { %s2896_s19 = sand.u32 (!%p309_p2), 1, %s2726_s12   ;;  %p3192_p6 = scmp.ne.s32.totalorder (!%p309_p2), %s3187_s21, 0 }
  0x34   : > { %312 = sbr.rel (%p309_p2) target bundleno = 1330 (0x532), region = 56  ;;  %s2527_s27 = sshll.u32 (!%p309_p2), %s2896_s19, 7 }
  0x35   : > { %s315_s28 = scalar_lea.sflag (!%p309_p2), [#allocation4], %s2896_s19  ;;  %s2900_s24 = scalar_lea.vmem (!%p309_p2), [#allocation3], %s2527_s27 }
  0x39   : > { %2713 = dma.done.wait (%p3192_p6), %s315_s28, 2048  }
  0x3a   : > { %2715 = vsyncadd (%p3192_p6), %s315_s28, 4294965248  ;;  %v2740_v1 = vmov 0.0   ;;  %v2741_v2 = vmov 0   ;;  %vm402_vm0 = vcmask 1041408   ;;  %v364_v3 = vld [vmem:[%s2900_s24 + $0x48] sm:$0x3] }
  0x3b   : > { %491 = vmatprep.mubr.f32.mxu0 %v2740_v1  ;;  %568 = vmatprep.mubr.f32.mxu1 %v2740_v1  ;;  %v366_v4 = vld [vmem:[%s2900_s24 + $0x58] sm:$0x3]  ;;  %v363_v5 = vld [vmem:[%s2900_s24 + $0x40] sm:$0x3]  ;;  %v365_v6 = vld [vmem:[%s2900_s24 + $0x50] sm:$0x3] }
  0x3c   : > { %2640 = vset.pattern.permute.xlu0 %v2741_v2  ;;  %2641 = vset.pattern.permute.xlu1 %v2741_v2  ;;  %v356_v7 = vld [vmem:[%s2900_s24 + $0x8] sm:$0xff]  ;;  %v358_v8 = vld [vmem:[%s2900_s24 + $0x18] sm:$0xff]  ;;  %v355_v9 = vld [vmem:[%s2900_s24] sm:$0xff]  ;;  %vm395_vm1 = vcmask 80896   ;;  %vm761_vm2 = vcmask 130048   ;;  %s2528_s21 = sshll.u32 %s2896_s19, 3 }
  0x3d   : > { %2529 = vmatprep.subr.msk.mxu0 %vm402_vm0, %v364_v3  ;;  %2533 = vmatprep.subr.msk.mxu1 %vm402_vm0, %v366_v4  ;;  %v357_v10 = vld [vmem:[%s2900_s24 + $0x10] sm:$0xff]  ;;  %v371_v11 = vld [vmem:[%s3174_s1] sm:$0xff]  ;;  %v368_v12 = vld [vmem:[%s2900_s24 + $0x68] sm:$0x3]  ;;  %s2587_s29 = sshll.u32 %s2818_s8, 7  ;;  %s352_s10 = scalar_lea.vmem [#allocation6], %s2528_s21 }
  0x3e   : > { %2530 = vmatpush1.msk.msra.mxu0 %vm402_vm0, %v363_v5  ;;  %2534 = vmatpush1.msk.msra.mxu1 %vm402_vm0, %v365_v6  ;;  %v370_v13 = vld [vmem:[%s2900_s24 + $0x78] sm:$0x3]  ;;  %v367_v14 = vld [vmem:[%s2900_s24 + $0x60] sm:$0x3]  ;;  %v369_v15 = vld [vmem:[%s2900_s24 + $0x70] sm:$0x3]  ;;  %s2448_s25 = scalar_lea.hbm %s3182_s9, %s2587_s29 }
  0x3f   : > { %457 = vmatprep.subr.mxu0 %v356_v7  ;;  %534 = vmatprep.subr.mxu1 %v358_v8  ;;  %v372_v16 = vld [vmem:[%s3174_s1 + $0x8] sm:$0xff]  ;;  %v362_v18 = vld [vmem:[%s2900_s24 + $0x38] sm:$0xff]  ;;  %v361_v20 = vld [vmem:[%s2900_s24 + $0x30] sm:$0xff]  ;;  %s2450_s15 = sshll.u32 %s352_s10, 4  ;;  %s2436_s18 = scalar_lea.sflag [#allocation5], %s2896_s19  ;;  %s2451_s15 = int_to_ptr.vmem [resolvable:$true] %s2450_s15 }
  0x40   : > { %458 = vmatpush1.msra.mxu0 %v355_v9  ;;  %535 = vmatpush1.msra.mxu1 %v357_v10  ;;  %v360_v17 = vld [vmem:[%s2900_s24 + $0x28] sm:$0xff]  ;;  %v359_v19 = vld [vmem:[%s2900_s24 + $0x20] sm:$0xff]  ;;  %v384_v24 = vld [vmem:[#allocation2] sm:$0x1]  ;;  %s2670_s26 = scalar_lea.vmem %s2451_s15, 128  ;;  %p3193_p12 = scmp.ne.s32.totalorder %s3188_s22, 0 }
  0x41   : > { %2531 = vmatmul.mubr.msk.f32.vlgmr.msra.gmra.mxu0 %vm395_vm1, %v371_v11  ;;  %2535 = vmatmul.mubr.msk.f32.vlgmr.msra.gmra.mxu1 %vm395_vm1, %v371_v11  ;;  %v374_v21 = vld [vmem:[%s3175_s2 + $0x8] sm:$0xff]  ;;  %v373_v22 = vld [vmem:[%s3175_s2] sm:$0xff]  ;;  %p2671_p11 = scmp.ne.s32.totalorder %s2451_s15, %s2670_s26  ;;  %s2743_s20 = smov [#allocation6]  }
  0x42   : > { %497 = vmatprep.mubr.f32.mxu0 %v2740_v1  ;;  %574 = vmatprep.mubr.f32.mxu1 %v2740_v1  ;;  %v382_v23 = vld [vmem:[%s3179_s6 + $0x8] sm:$0xff]  ;;  %v377_v26 = vld [vmem:[%s3177_s4] sm:$0xff]  ;;  %s2674_s27 = sshll.u32 %s2743_s20, 4  ;;  %s2675_s27 = int_to_ptr.vmem [resolvable:$false] %s2674_s27 }
  0x43   : > { %2537 = vmatprep.subr.msk.mxu0 %vm402_vm0, %v368_v12  ;;  %2541 = vmatprep.subr.msk.mxu1 %vm402_vm0, %v370_v13  ;;  %v378_v25 = vld [vmem:[%s3177_s4 + $0x8] sm:$0xff]  ;;  %v381_v27 = vld [vmem:[%s3179_s6] sm:$0xff]  ;;  %p2672_p13 = pnand %p2671_p11, %p3193_p12  ;;  %s2676_s8 = scalar_lea.vmem %s2675_s27, 256 }
  0x44   : > { %2538 = vmatpush1.msk.msra.mxu0 %vm402_vm0, %v367_v14  ;;  %2542 = vmatpush1.msk.msra.mxu1 %vm402_vm0, %v369_v15  ;;  %v2975_v60 = vld [vmem:[%s3176_s3] sm:$0xff]  ;;  %v2986_v6 = vld [vmem:[%s3176_s3 + $0x8] sm:$0xff]  ;;  %p2677_p5 = scmp.lt.s32.totalorder %s2451_s15, %s2675_s27  ;;  %p2678_p7 = scmp.lt.s32.totalorder %s2676_s8, %s2670_s26 }
  0x45   : > { %2532 = vmatmul.mubr.msk.f32.gmra.mxu0 %vm395_vm1, %v372_v16  ;;  %2536 = vmatmul.mubr.msk.f32.gmra.mxu1 %vm395_vm1, %v372_v16  ;;  %p2673_p4 = pneg %p2672_p13 }
  0x46   : > { %611 = vmatprep.subr.mxu0 %v360_v17  ;;  %688 = vmatprep.subr.mxu1 %v362_v18  ;;  %p2679_p8 = por %p2678_p7, %p2677_p5 }
  0x47   : > { %612 = vmatpush1.msra.mxu0 %v359_v19  ;;  %645 = vmatprep.mubr.f32.mxu0 %v2740_v1 }
  0x48   : > { %689 = vmatpush1.msra.mxu1 %v361_v20  ;;  %722 = vmatprep.mubr.f32.mxu1 %v2740_v1  ;;  %p2680_p10 = pnand %p2679_p8, %p2673_p4 }
  0x49   : > { %2539 = vmatmul.mubr.msk.f32.vlgmr.msra.gmra.mxu0 %vm395_vm1, %v371_v11  ;;  %2543 = vmatmul.mubr.msk.f32.vlgmr.msra.gmra.mxu1 %vm395_vm1, %v371_v11 }
  0x4a   : > { %651 = vmatprep.mubr.f32.mxu0 %v2740_v1  ;;  %728 = vmatprep.mubr.f32.mxu1 %v2740_v1 }
  0x4b   : > { %392 = vperm.xlu0 %2640, %v374_v21   ;;  %758 = vperm.xlu1 %2641, %v378_v25  }
  0x4d   : > { %2540 = vmatmul.mubr.msk.f32.gmra.mxu0 %vm395_vm1, %v372_v16  ;;  %2544 = vmatmul.mubr.msk.f32.gmra.mxu1 %vm395_vm1, %v372_v16 }
  0x4e   : > { %832 = vmatprep.mubr.f32.mxu0 %v2740_v1  ;;  %909 = vmatprep.mubr.f32.mxu1 %v2740_v1 }
  0x4f   : > { %387 = vperm.xlu0 %2640, %v373_v22   ;;  %753 = vperm.xlu1 %2641, %v377_v26  }
  0x53   : > { %1423 = vperm.xlu0 %2640, %v382_v23   ;;  %1418 = vperm.xlu1 %2641, %v381_v27  }
  0x57   : > { %2082 = vperm.xlu0 %2640, %v384_v24  }
  0xc6   : > { %v393_v28 = vpop.permute.xlu0 %392  ;;  %v3006_v17 = vpop.permute.xlu1 %758 }
  0xca   : > { %v388_v35 = vpop.permute.xlu0 %387  ;;  %v3008_v24 = vpop.permute.xlu1 %753 }
 0x101   : > { %v493_v29 = vpop.f32.mrf.mxu0  ;;  %v570_v30 = vpop.f32.mrf.mxu1 }
 0x102   : > { %v494_v44 = vadd.f32 %v493_v29, %v388_v35  ;;  %v571_v45 = vadd.f32 %v570_v30, %v388_v35 }
 0x103   : > { %v495_v31 = vpop.f32.mrf.mxu0  ;;  %v572_v32 = vpop.f32.mrf.mxu1 }
 0x104   : > { %v496_v40 = vadd.f32 %v495_v31, %v388_v35  ;;  %v573_v41 = vadd.f32 %v572_v32, %v388_v35  ;;  %v735_v56 = vmax.f32 %v494_v44, 0.0  ;;  %v737_v57 = vmax.f32 %v571_v45, 0.0 }
 0x105   : > { %v499_v33 = vpop.f32.mrf.mxu0  ;;  %v576_v34 = vpop.f32.mrf.mxu1 }
 0x106   : > { %v500_v36 = vadd.f32 %v499_v33, %v393_v28  ;;  %v577_v37 = vadd.f32 %v576_v34, %v393_v28  ;;  %v736_v54 = vmax.f32 %v496_v40, 0.0  ;;  %v738_v55 = vmax.f32 %v573_v41, 0.0 }
 0x107   : > { %v501_v38 = vpop.f32.mrf.mxu0  ;;  %v578_v39 = vpop.f32.mrf.mxu1 }
 0x108   : > { %v502_v42 = vadd.f32 %v501_v38, %v393_v28  ;;  %v579_v43 = vadd.f32 %v578_v39, %v393_v28  ;;  %v743_v50 = vmax.f32 %v500_v36, 0.0  ;;  %v745_v51 = vmax.f32 %v577_v37, 0.0 }
 0x109   : > { %v647_v46 = vpop.f32.mrf.mxu0  ;;  %v724_v47 = vpop.f32.mrf.mxu1 }
 0x10a   : > { %v744_v48 = vmax.f32 %v502_v42, 0.0  ;;  %v746_v49 = vmax.f32 %v579_v43, 0.0  ;;  %v648_v7 = vadd.f32 %v647_v46, %v388_v35  ;;  %v725_v10 = vadd.f32 %v724_v47, %v388_v35 }
 0x10b   : > { %v649_v52 = vpop.f32.mrf.mxu0  ;;  %v726_v53 = vpop.f32.mrf.mxu1 }
 0x10c   : > { %796 = vmatprep.subr.mxu0 %v744_v48  ;;  %873 = vmatprep.subr.mxu1 %v746_v49  ;;  %v650_v4 = vadd.f32 %v649_v52, %v388_v35  ;;  %v727_v5 = vadd.f32 %v726_v53, %v388_v35  ;;  %v739_v15 = vmax.f32 %v648_v7, 0.0  ;;  %v741_v16 = vmax.f32 %v725_v10, 0.0 }
 0x10d   : > { %v653_v58 = vpop.f32.mrf.mxu0  ;;  %v730_v59 = vpop.f32.mrf.mxu1  ;;  %797 = vmatpush1.msra.mxu0 %v743_v50  ;;  %874 = vmatpush1.msra.mxu1 %v745_v51 }
 0x10e   : > { %798 = vmatprep.subr.mxu0 %v736_v54  ;;  %875 = vmatprep.subr.mxu1 %v738_v55  ;;  %v654_v61 = vadd.f32 %v653_v58, %v393_v28  ;;  %v731_v0 = vadd.f32 %v730_v59, %v393_v28  ;;  %v740_v13 = vmax.f32 %v650_v4, 0.0  ;;  %v742_v14 = vmax.f32 %v727_v5, 0.0 }
 0x10f   : > { %v655_v62 = vpop.f32.mrf.mxu0  ;;  %v732_v63 = vpop.f32.mrf.mxu1  ;;  %799 = vmatpush1.msra.mxu0 %v735_v56  ;;  %876 = vmatpush1.msra.mxu1 %v737_v57 }
 0x110   : > { %v656_v2 = vadd.f32 %v655_v62, %v393_v28  ;;  %v733_v3 = vadd.f32 %v732_v63, %v393_v28  ;;  %2545 = vmatmul.mubr.msk.f32.vlgmr.msra.gmra.mxu0 %vm761_vm2, %v2975_v60  ;;  %2547 = vmatmul.mubr.msk.f32.vlgmr.msra.gmra.mxu1 %vm761_vm2, %v2975_v60  ;;  %v747_v11 = vmax.f32 %v654_v61, 0.0  ;;  %v749_v12 = vmax.f32 %v731_v0, 0.0 }
 0x111   : > { %838 = vmatprep.mubr.f32.mxu0 %v2740_v1  ;;  %915 = vmatprep.mubr.f32.mxu1 %v2740_v1 }
 0x112   : > { %v748_v8 = vmax.f32 %v656_v2, 0.0  ;;  %v750_v9 = vmax.f32 %v733_v3, 0.0 }
 0x114   : > { %2546 = vmatmul.mubr.msk.f32.gmra.mxu0 %vm761_vm2, %v2986_v6  ;;  %2548 = vmatmul.mubr.msk.f32.gmra.mxu1 %vm761_vm2, %v2986_v6 }
 0x115   : > { %950 = vmatprep.subr.mxu0 %v748_v8  ;;  %1027 = vmatprep.subr.mxu1 %v750_v9 }
 0x116   : > { %951 = vmatpush1.msra.mxu0 %v747_v11  ;;  %1028 = vmatpush1.msra.mxu1 %v749_v12 }
 0x117   : > { %952 = vmatprep.subr.mxu0 %v740_v13  ;;  %1029 = vmatprep.subr.mxu1 %v742_v14 }
 0x118   : > { %953 = vmatpush1.msra.mxu0 %v739_v15  ;;  %986 = vmatprep.mubr.f32.mxu0 %v2740_v1 }
 0x119   : > { %1030 = vmatpush1.msra.mxu1 %v741_v16  ;;  %1063 = vmatprep.mubr.f32.mxu1 %v2740_v1 }
 0x11a   : > { %2549 = vmatmul.mubr.msk.f32.vlgmr.msra.gmra.mxu0 %vm761_vm2, %v2975_v60  ;;  %2551 = vmatmul.mubr.msk.f32.vlgmr.msra.gmra.mxu1 %vm761_vm2, %v2975_v60 }
 0x11b   : > { %992 = vmatprep.mubr.f32.mxu0 %v2740_v1  ;;  %1069 = vmatprep.mubr.f32.mxu1 %v2740_v1 }
 0x11e   : > { %2550 = vmatmul.mubr.msk.f32.gmra.mxu0 %vm761_vm2, %v2986_v6  ;;  %2552 = vmatmul.mubr.msk.f32.gmra.mxu1 %vm761_vm2, %v2986_v6 }
 0x11f   : > { %1156 = vmatprep.mubr.f32.mxu0 %v2740_v1  ;;  %1233 = vmatprep.mubr.f32.mxu1 %v2740_v1 }
 0x1d0   : > { %v834_v18 = vpop.f32.mrf.mxu0  ;;  %v911_v19 = vpop.f32.mrf.mxu1 }
 0x1d1   : > { %v835_v33 = vadd.f32 %v834_v18, %v3008_v24  ;;  %v912_v34 = vadd.f32 %v911_v19, %v3008_v24 }
 0x1d2   : > { %v836_v20 = vpop.f32.mrf.mxu0  ;;  %v913_v21 = vpop.f32.mrf.mxu1 }
 0x1d3   : > { %v837_v29 = vadd.f32 %v836_v20, %v3008_v24  ;;  %v914_v30 = vadd.f32 %v913_v21, %v3008_v24  ;;  %v1076_v43 = vmax.f32 %v835_v33, 0.0  ;;  %v1078_v44 = vmax.f32 %v912_v34, 0.0 }
 0x1d4   : > { %v840_v22 = vpop.f32.mrf.mxu0  ;;  %v917_v23 = vpop.f32.mrf.mxu1 }
 0x1d5   : > { %v841_v25 = vadd.f32 %v840_v22, %v3006_v17  ;;  %v918_v26 = vadd.f32 %v917_v23, %v3006_v17  ;;  %v1077_v41 = vmax.f32 %v837_v29, 0.0  ;;  %v1079_v42 = vmax.f32 %v914_v30, 0.0 }
 0x1d6   : > { %v842_v27 = vpop.f32.mrf.mxu0  ;;  %v919_v28 = vpop.f32.mrf.mxu1 }
 0x1d7   : > { %v843_v31 = vadd.f32 %v842_v27, %v3006_v17  ;;  %v920_v32 = vadd.f32 %v919_v28, %v3006_v17  ;;  %v1084_v37 = vmax.f32 %v841_v25, 0.0  ;;  %v1086_v38 = vmax.f32 %v918_v26, 0.0 }
 0x1d9   : > { %v1085_v35 = vmax.f32 %v843_v31, 0.0  ;;  %v1087_v36 = vmax.f32 %v920_v32, 0.0 }
 0x1da   : > { %v988_v39 = vpop.f32.mrf.mxu0  ;;  %v1065_v40 = vpop.f32.mrf.mxu1 }
 0x1db   : > { %1120 = vmatprep.subr.mxu0 %v1085_v35  ;;  %1197 = vmatprep.subr.mxu1 %v1087_v36  ;;  %v989_v57 = vadd.f32 %v988_v39, %v3008_v24  ;;  %v1066_v58 = vadd.f32 %v1065_v40, %v3008_v24  ;;  %v379_v36 = vld [vmem:[%s3178_s5] sm:$0xff] }
 0x1dc   : > { %v990_v45 = vpop.f32.mrf.mxu0  ;;  %v1067_v46 = vpop.f32.mrf.mxu1  ;;  %1121 = vmatpush1.msra.mxu0 %v1084_v37  ;;  %1198 = vmatpush1.msra.mxu1 %v1086_v38 }
 0x1dd   : > { %1122 = vmatprep.subr.mxu0 %v1077_v41  ;;  %1199 = vmatprep.subr.mxu1 %v1079_v42  ;;  %v991_v53 = vadd.f32 %v990_v45, %v3008_v24  ;;  %v1068_v54 = vadd.f32 %v1067_v46, %v3008_v24  ;;  %v1080_v3 = vmax.f32 %v989_v57, 0.0  ;;  %v1082_v4 = vmax.f32 %v1066_v58, 0.0 }
 0x1de   : > { %v994_v47 = vpop.f32.mrf.mxu0  ;;  %v1071_v48 = vpop.f32.mrf.mxu1  ;;  %1123 = vmatpush1.msra.mxu0 %v1076_v43  ;;  %1200 = vmatpush1.msra.mxu1 %v1078_v44  ;;  %v380_v43 = vld [vmem:[%s3178_s5 + $0x8] sm:$0xff] }
 0x1df   : > { %2553 = vmatmul.mubr.msk.f32.vlgmr.msra.gmra.mxu0 %vm761_vm2, %v2975_v60  ;;  %2555 = vmatmul.mubr.msk.f32.vlgmr.msra.gmra.mxu1 %vm761_vm2, %v2975_v60  ;;  %v995_v49 = vadd.f32 %v994_v47, %v3006_v17  ;;  %v1072_v50 = vadd.f32 %v1071_v48, %v3006_v17  ;;  %v1081_v0 = vmax.f32 %v991_v53, 0.0  ;;  %v1083_v2 = vmax.f32 %v1068_v54, 0.0 }
 0x1e0   : > { %v996_v51 = vpop.f32.mrf.mxu0  ;;  %v1073_v52 = vpop.f32.mrf.mxu1  ;;  %1162 = vmatprep.mubr.f32.mxu0 %v2740_v1  ;;  %1239 = vmatprep.mubr.f32.mxu1 %v2740_v1 }
 0x1e1   : > { %v997_v55 = vadd.f32 %v996_v51, %v3006_v17  ;;  %v1074_v56 = vadd.f32 %v1073_v52, %v3006_v17  ;;  %v1088_v62 = vmax.f32 %v995_v49, 0.0  ;;  %v1090_v63 = vmax.f32 %v1072_v50, 0.0 }
 0x1e3   : > { %v1089_v59 = vmax.f32 %v997_v55, 0.0  ;;  %v1091_v61 = vmax.f32 %v1074_v56, 0.0  ;;  %2554 = vmatmul.mubr.msk.f32.gmra.mxu0 %vm761_vm2, %v2986_v6  ;;  %2556 = vmatmul.mubr.msk.f32.gmra.mxu1 %vm761_vm2, %v2986_v6 }
 0x1e4   : > { %1310 = vmatprep.mubr.f32.mxu0 %v2740_v1  ;;  %1387 = vmatprep.mubr.f32.mxu1 %v2740_v1 }
 0x1e5   : > { %1274 = vmatprep.subr.mxu0 %v1089_v59  ;;  %1351 = vmatprep.subr.mxu1 %v1091_v61 }
 0x1e6   : > { %1275 = vmatpush1.msra.mxu0 %v1088_v62  ;;  %1352 = vmatpush1.msra.mxu1 %v1090_v63 }
 0x1e7   : > { %1276 = vmatprep.subr.mxu0 %v1081_v0  ;;  %1353 = vmatprep.subr.mxu1 %v1083_v2  ;;  %v1424_v2 = vpop.permute.xlu0 %1423 }
 0x1e8   : > { %1277 = vmatpush1.msra.mxu0 %v1080_v3  ;;  %1354 = vmatpush1.msra.mxu1 %v1082_v4  ;;  %v1419_v3 = vpop.permute.xlu1 %1418 }
 0x1e9   : > { %2557 = vmatmul.mubr.msk.f32.vlgmr.msra.gmra.mxu0 %vm761_vm2, %v2975_v60  ;;  %2559 = vmatmul.mubr.msk.f32.vlgmr.msra.gmra.mxu1 %vm761_vm2, %v2975_v60 }
 0x1ea   : > { %1316 = vmatprep.mubr.f32.mxu0 %v2740_v1  ;;  %1393 = vmatprep.mubr.f32.mxu1 %v2740_v1 }
 0x1ed   : > { %2558 = vmatmul.mubr.msk.f32.gmra.mxu0 %vm761_vm2, %v2986_v6  ;;  %2560 = vmatmul.mubr.msk.f32.gmra.mxu1 %vm761_vm2, %v2986_v6 }
 0x1ee   : > { %1496 = vmatprep.mubr.f32.mxu0 %v2740_v1  ;;  %1573 = vmatprep.mubr.f32.mxu1 %v2740_v1 }
 0x29f   : > { %v1158_v5 = vpop.f32.mrf.mxu0  ;;  %v1235_v7 = vpop.f32.mrf.mxu1 }
 0x2a0   : > { %v1159_v21 = vadd.f32 %v1158_v5, %v3008_v24  ;;  %v1236_v22 = vadd.f32 %v1235_v7, %v3008_v24 }
 0x2a1   : > { %v1160_v8 = vpop.f32.mrf.mxu0  ;;  %v1237_v9 = vpop.f32.mrf.mxu1 }
 0x2a2   : > { %v1161_v16 = vadd.f32 %v1160_v8, %v3008_v24  ;;  %v1238_v18 = vadd.f32 %v1237_v9, %v3008_v24  ;;  %v1400_v32 = vmax.f32 %v1159_v21, 0.0  ;;  %v1402_v33 = vmax.f32 %v1236_v22, 0.0 }
 0x2a3   : > { %v1164_v10 = vpop.f32.mrf.mxu0  ;;  %v1241_v11 = vpop.f32.mrf.mxu1 }
 0x2a4   : > { %v1165_v12 = vadd.f32 %v1164_v10, %v3006_v17  ;;  %v1242_v13 = vadd.f32 %v1241_v11, %v3006_v17  ;;  %v1401_v30 = vmax.f32 %v1161_v16, 0.0  ;;  %v1403_v31 = vmax.f32 %v1238_v18, 0.0 }
 0x2a5   : > { %v1166_v14 = vpop.f32.mrf.mxu0  ;;  %v1243_v15 = vpop.f32.mrf.mxu1 }
 0x2a6   : > { %v1167_v19 = vadd.f32 %v1166_v14, %v3006_v17  ;;  %v1244_v20 = vadd.f32 %v1243_v15, %v3006_v17  ;;  %v1408_v26 = vmax.f32 %v1165_v12, 0.0  ;;  %v1410_v27 = vmax.f32 %v1242_v13, 0.0 }
 0x2a8   : > { %v1409_v23 = vmax.f32 %v1167_v19, 0.0  ;;  %v1411_v25 = vmax.f32 %v1244_v20, 0.0 }
 0x2a9   : > { %v1312_v28 = vpop.f32.mrf.mxu0  ;;  %v1389_v29 = vpop.f32.mrf.mxu1 }
 0x2aa   : > { %1460 = vmatprep.subr.mxu0 %v1409_v23  ;;  %1537 = vmatprep.subr.mxu1 %v1411_v25  ;;  %v1313_v48 = vadd.f32 %v1312_v28, %v3008_v24  ;;  %v1390_v49 = vadd.f32 %v1389_v29, %v3008_v24 }
 0x2ab   : > { %v1314_v34 = vpop.f32.mrf.mxu0  ;;  %v1391_v35 = vpop.f32.mrf.mxu1  ;;  %1461 = vmatpush1.msra.mxu0 %v1408_v26  ;;  %1538 = vmatpush1.msra.mxu1 %v1410_v27 }
 0x2ac   : > { %1462 = vmatprep.subr.mxu0 %v1401_v30  ;;  %1539 = vmatprep.subr.mxu1 %v1403_v31  ;;  %v1315_v44 = vadd.f32 %v1314_v34, %v3008_v24  ;;  %v1392_v45 = vadd.f32 %v1391_v35, %v3008_v24  ;;  %v1404_v56 = vmax.f32 %v1313_v48, 0.0  ;;  %v1406_v57 = vmax.f32 %v1390_v49, 0.0 }
 0x2ad   : > { %v1318_v37 = vpop.f32.mrf.mxu0  ;;  %v1395_v38 = vpop.f32.mrf.mxu1  ;;  %1463 = vmatpush1.msra.mxu0 %v1400_v32  ;;  %1540 = vmatpush1.msra.mxu1 %v1402_v33 }
 0x2ae   : > { %2561 = vmatmul.mubr.msk.f32.vlgmr.msra.gmra.mxu0 %vm761_vm2, %v379_v36  ;;  %2563 = vmatmul.mubr.msk.f32.vlgmr.msra.gmra.mxu1 %vm761_vm2, %v379_v36  ;;  %v1319_v39 = vadd.f32 %v1318_v37, %v3006_v17  ;;  %v1396_v40 = vadd.f32 %v1395_v38, %v3006_v17  ;;  %v1405_v54 = vmax.f32 %v1315_v44, 0.0  ;;  %v1407_v55 = vmax.f32 %v1392_v45, 0.0 }
 0x2af   : > { %v1320_v41 = vpop.f32.mrf.mxu0  ;;  %v1397_v42 = vpop.f32.mrf.mxu1  ;;  %1502 = vmatprep.mubr.f32.mxu0 %v2740_v1  ;;  %1579 = vmatprep.mubr.f32.mxu1 %v2740_v1 }
 0x2b0   : > { %v1321_v46 = vadd.f32 %v1320_v41, %v3006_v17  ;;  %v1398_v47 = vadd.f32 %v1397_v42, %v3006_v17  ;;  %v1412_v52 = vmax.f32 %v1319_v39, 0.0  ;;  %v1414_v53 = vmax.f32 %v1396_v40, 0.0 }
 0x2b2   : > { %v1413_v50 = vmax.f32 %v1321_v46, 0.0  ;;  %v1415_v51 = vmax.f32 %v1398_v47, 0.0  ;;  %2562 = vmatmul.mubr.msk.f32.gmra.mxu0 %vm761_vm2, %v380_v43  ;;  %2564 = vmatmul.mubr.msk.f32.gmra.mxu1 %vm761_vm2, %v380_v43 }
 0x2b3   : > { %1650 = vmatprep.mubr.f32.mxu0 %v2740_v1  ;;  %1727 = vmatprep.mubr.f32.mxu1 %v2740_v1 }
 0x2b4   : > { %1614 = vmatprep.subr.mxu0 %v1413_v50  ;;  %1691 = vmatprep.subr.mxu1 %v1415_v51 }
 0x2b5   : > { %1615 = vmatpush1.msra.mxu0 %v1412_v52  ;;  %1692 = vmatpush1.msra.mxu1 %v1414_v53 }
 0x2b6   : > { %1616 = vmatprep.subr.mxu0 %v1405_v54  ;;  %1693 = vmatprep.subr.mxu1 %v1407_v55 }
 0x2b7   : > { %1617 = vmatpush1.msra.mxu0 %v1404_v56  ;;  %1694 = vmatpush1.msra.mxu1 %v1406_v57 }
 0x2b8   : > { %2565 = vmatmul.mubr.msk.f32.vlgmr.msra.gmra.mxu0 %vm761_vm2, %v379_v36  ;;  %2567 = vmatmul.mubr.msk.f32.vlgmr.msra.gmra.mxu1 %vm761_vm2, %v379_v36 }
 0x2b9   : > { %1656 = vmatprep.mubr.f32.mxu0 %v2740_v1  ;;  %1733 = vmatprep.mubr.f32.mxu1 %v2740_v1 }
 0x2bc   : > { %2566 = vmatmul.mubr.msk.f32.gmra.mxu0 %vm761_vm2, %v380_v43  ;;  %2568 = vmatmul.mubr.msk.f32.gmra.mxu1 %vm761_vm2, %v380_v43 }
 0x2bd   : > { %1820 = vmatprep.mubr.f32.mxu0 %v2740_v1  ;;  %1897 = vmatprep.mubr.f32.mxu1 %v2740_v1 }
 0x36e   : > { %v1498_v58 = vpop.f32.mrf.mxu0  ;;  %v1575_v59 = vpop.f32.mrf.mxu1 }
 0x36f   : > { %v1499_v13 = vadd.f32 %v1498_v58, %v1419_v3  ;;  %v1576_v14 = vadd.f32 %v1575_v59, %v1419_v3 }
 0x370   : > { %v1500_v61 = vpop.f32.mrf.mxu0  ;;  %v1577_v62 = vpop.f32.mrf.mxu1 }
 0x371   : > { %v1501_v9 = vadd.f32 %v1500_v61, %v1419_v3  ;;  %v1578_v10 = vadd.f32 %v1577_v62, %v1419_v3  ;;  %v1740_v25 = vmax.f32 %v1499_v13, 0.0  ;;  %v1742_v26 = vmax.f32 %v1576_v14, 0.0  ;;  %v383_v14 = vld [vmem:[%s3180_s7] sm:$0x1] }
 0x372   : > { %v1504_v63 = vpop.f32.mrf.mxu0  ;;  %v1581_v0 = vpop.f32.mrf.mxu1 }
 0x373   : > { %v1505_v4 = vadd.f32 %v1504_v63, %v1424_v2  ;;  %v1582_v5 = vadd.f32 %v1581_v0, %v1424_v2  ;;  %v1741_v22 = vmax.f32 %v1501_v9, 0.0  ;;  %v1743_v23 = vmax.f32 %v1578_v10, 0.0 }
 0x374   : > { %v1506_v7 = vpop.f32.mrf.mxu0  ;;  %v1583_v8 = vpop.f32.mrf.mxu1 }
 0x375   : > { %v1507_v11 = vadd.f32 %v1506_v7, %v1424_v2  ;;  %v1584_v12 = vadd.f32 %v1583_v8, %v1424_v2  ;;  %v1748_v18 = vmax.f32 %v1505_v4, 0.0  ;;  %v1750_v19 = vmax.f32 %v1582_v5, 0.0 }
 0x377   : > { %v1749_v15 = vmax.f32 %v1507_v11, 0.0  ;;  %v1751_v16 = vmax.f32 %v1584_v12, 0.0 }
 0x378   : > { %v1652_v20 = vpop.f32.mrf.mxu0  ;;  %v1729_v21 = vpop.f32.mrf.mxu1 }
 0x379   : > { %1784 = vmatprep.subr.mxu0 %v1749_v15  ;;  %1861 = vmatprep.subr.mxu1 %v1751_v16  ;;  %v1653_v39 = vadd.f32 %v1652_v20, %v1419_v3  ;;  %v1730_v40 = vadd.f32 %v1729_v21, %v1419_v3 }
 0x37a   : > { %v1654_v27 = vpop.f32.mrf.mxu0  ;;  %v1731_v28 = vpop.f32.mrf.mxu1  ;;  %1785 = vmatpush1.msra.mxu0 %v1748_v18  ;;  %1862 = vmatpush1.msra.mxu1 %v1750_v19 }
 0x37b   : > { %1786 = vmatprep.subr.mxu0 %v1741_v22  ;;  %1863 = vmatprep.subr.mxu1 %v1743_v23  ;;  %v1655_v35 = vadd.f32 %v1654_v27, %v1419_v3  ;;  %v1732_v36 = vadd.f32 %v1731_v28, %v1419_v3  ;;  %v1744_v47 = vmax.f32 %v1653_v39, 0.0  ;;  %v1746_v48 = vmax.f32 %v1730_v40, 0.0 }
 0x37c   : > { %v1658_v29 = vpop.f32.mrf.mxu0  ;;  %v1735_v30 = vpop.f32.mrf.mxu1  ;;  %1787 = vmatpush1.msra.mxu0 %v1740_v25  ;;  %1864 = vmatpush1.msra.mxu1 %v1742_v26 }
 0x37d   : > { %2569 = vmatmul.mubr.msk.f32.vlgmr.msra.gmra.mxu0 %vm761_vm2, %v2975_v60  ;;  %2571 = vmatmul.mubr.msk.f32.vlgmr.msra.gmra.mxu1 %vm761_vm2, %v2975_v60  ;;  %v1659_v31 = vadd.f32 %v1658_v29, %v1424_v2  ;;  %v1736_v32 = vadd.f32 %v1735_v30, %v1424_v2  ;;  %v1745_v45 = vmax.f32 %v1655_v35, 0.0  ;;  %v1747_v46 = vmax.f32 %v1732_v36, 0.0 }
 0x37e   : > { %v1660_v33 = vpop.f32.mrf.mxu0  ;;  %v1737_v34 = vpop.f32.mrf.mxu1  ;;  %1826 = vmatprep.mubr.f32.mxu0 %v2740_v1  ;;  %1903 = vmatprep.mubr.f32.mxu1 %v2740_v1 }
 0x37f   : > { %v1661_v37 = vadd.f32 %v1660_v33, %v1424_v2  ;;  %v1738_v38 = vadd.f32 %v1737_v34, %v1424_v2  ;;  %v1752_v43 = vmax.f32 %v1659_v31, 0.0  ;;  %v1754_v44 = vmax.f32 %v1736_v32, 0.0 }
 0x381   : > { %v1753_v41 = vmax.f32 %v1661_v37, 0.0  ;;  %v1755_v42 = vmax.f32 %v1738_v38, 0.0  ;;  %2570 = vmatmul.mubr.msk.f32.gmra.mxu0 %vm761_vm2, %v2986_v6  ;;  %2572 = vmatmul.mubr.msk.f32.gmra.mxu1 %vm761_vm2, %v2986_v6  ;;  %v2083_v37 = vpop.permute.xlu0 %2082  ;;  %v2742_v38 = vmov 1966171168  }
 0x382   : > { %1974 = vmatprep.mubr.f32.mxu0 %v2740_v1  ;;  %2051 = vmatprep.mubr.f32.mxu1 %v2740_v1  ;;  %v2389_v39 = vunpack.c.l.s4 %v2742_v38 }
 0x383   : > { %1938 = vmatprep.subr.mxu0 %v1753_v41  ;;  %2015 = vmatprep.subr.mxu1 %v1755_v42 }
 0x384   : > { %1939 = vmatpush1.msra.mxu0 %v1752_v43  ;;  %2016 = vmatpush1.msra.mxu1 %v1754_v44 }
 0x385   : > { %1940 = vmatprep.subr.mxu0 %v1745_v45  ;;  %2017 = vmatprep.subr.mxu1 %v1747_v46  ;;  %v2390_v45 = vunpack.c.0.s8 %v2389_v39 }
 0x386   : > { %1941 = vmatpush1.msra.mxu0 %v1744_v47  ;;  %2018 = vmatpush1.msra.mxu1 %v1746_v48 }
 0x387   : > { %2573 = vmatmul.mubr.msk.f32.vlgmr.msra.gmra.mxu0 %vm761_vm2, %v2975_v60  ;;  %2575 = vmatmul.mubr.msk.f32.vlgmr.msra.gmra.mxu1 %vm761_vm2, %v2975_v60 }
 0x388   : > { %1980 = vmatprep.mubr.f32.mxu0 %v2740_v1  ;;  %2057 = vmatprep.mubr.f32.mxu1 %v2740_v1 }
 0x38b   : > { %2574 = vmatmul.mubr.msk.f32.gmra.mxu0 %vm761_vm2, %v2986_v6  ;;  %2576 = vmatmul.mubr.msk.f32.gmra.mxu1 %vm761_vm2, %v2986_v6 }
 0x38c   : > { %2156 = vmatprep.mubr.f32.mxu0 %v2740_v1  ;;  %2227 = vmatprep.mubr.f32.mxu1 %v2740_v1 }
 0x43d   : > { %v1822_v49 = vpop.f32.mrf.mxu0  ;;  %v1899_v50 = vpop.f32.mrf.mxu1 }
 0x43e   : > { %v1823_v62 = vadd.f32 %v1822_v49, %v3008_v24  ;;  %v1900_v63 = vadd.f32 %v1899_v50, %v3008_v24 }
 0x43f   : > { %v1824_v51 = vpop.f32.mrf.mxu0  ;;  %v1901_v52 = vpop.f32.mrf.mxu1 }
 0x440   : > { %v1825_v58 = vadd.f32 %v1824_v51, %v3008_v24  ;;  %v1902_v6 = vadd.f32 %v1901_v52, %v3008_v24  ;;  %v2064_v10 = vmax.f32 %v1823_v62, 0.0  ;;  %v2066_v11 = vmax.f32 %v1900_v63, 0.0 }
 0x441   : > { %v1828_v53 = vpop.f32.mrf.mxu0  ;;  %v1905_v60 = vpop.f32.mrf.mxu1 }
 0x442   : > { %v1829_v54 = vadd.f32 %v1828_v53, %v3006_v17  ;;  %v1906_v55 = vadd.f32 %v1905_v60, %v3006_v17  ;;  %v2065_v8 = vmax.f32 %v1825_v58, 0.0  ;;  %v2067_v9 = vmax.f32 %v1902_v6, 0.0 }
 0x443   : > { %v1830_v56 = vpop.f32.mrf.mxu0  ;;  %v1907_v57 = vpop.f32.mrf.mxu1 }
 0x444   : > { %v1831_v59 = vadd.f32 %v1830_v56, %v3006_v17  ;;  %v1908_v61 = vadd.f32 %v1907_v57, %v3006_v17  ;;  %v2072_v3 = vmax.f32 %v1829_v54, 0.0  ;;  %v2074_v4 = vmax.f32 %v1906_v55, 0.0 }
 0x446   : > { %v2073_v0 = vmax.f32 %v1831_v59, 0.0  ;;  %v2075_v2 = vmax.f32 %v1908_v61, 0.0 }
 0x447   : > { %v1976_v5 = vpop.f32.mrf.mxu0  ;;  %v2053_v7 = vpop.f32.mrf.mxu1 }
 0x448   : > { %2120 = vmatprep.subr.mxu0 %v2073_v0  ;;  %2191 = vmatprep.subr.mxu1 %v2075_v2  ;;  %v1977_v27 = vadd.f32 %v1976_v5, %v3008_v24  ;;  %v2054_v28 = vadd.f32 %v2053_v7, %v3008_v24 }
 0x449   : > { %v1978_v12 = vpop.f32.mrf.mxu0  ;;  %v2055_v13 = vpop.f32.mrf.mxu1  ;;  %2121 = vmatpush1.msra.mxu0 %v2072_v3  ;;  %2192 = vmatpush1.msra.mxu1 %v2074_v4 }
 0x44a   : > { %2122 = vmatprep.subr.mxu0 %v2065_v8  ;;  %2193 = vmatprep.subr.mxu1 %v2067_v9  ;;  %v1979_v22 = vadd.f32 %v1978_v12, %v3008_v24  ;;  %v2056_v23 = vadd.f32 %v2055_v13, %v3008_v24  ;;  %v2070_v35 = vmax.f32 %v2054_v28, 0.0 }
 0x44b   : > { %v1982_v15 = vpop.f32.mrf.mxu0  ;;  %v2059_v16 = vpop.f32.mrf.mxu1  ;;  %2123 = vmatpush1.msra.mxu0 %v2064_v10  ;;  %2194 = vmatpush1.msra.mxu1 %v2066_v11 }
 0x44c   : > { %2577 = vmatmul.mubr.msk.f32.vlgmr.msra.gmra.mxu0 %vm761_vm2, %v383_v14  ;;  %2578 = vmatmul.mubr.msk.f32.vlgmr.msra.gmra.mxu1 %vm761_vm2, %v383_v14  ;;  %v1983_v18 = vadd.f32 %v1982_v15, %v3006_v17  ;;  %v2060_v19 = vadd.f32 %v2059_v16, %v3006_v17  ;;  %v2069_v33 = vmax.f32 %v1979_v22, 0.0  ;;  %v2071_v34 = vmax.f32 %v2056_v23, 0.0 }
 0x44d   : > { %v1984_v20 = vpop.f32.mrf.mxu0  ;;  %v2061_v21 = vpop.f32.mrf.mxu1  ;;  %2298 = vmatprep.mubr.f32.mxu0 %v2740_v1  ;;  %2369 = vmatprep.mubr.f32.mxu1 %v2740_v1  ;;  %v2068_v1 = vmax.f32 %v1977_v27, 0.0 }
 0x44e   : > { %v1985_v25 = vadd.f32 %v1984_v20, %v3006_v17  ;;  %v2062_v26 = vadd.f32 %v2061_v21, %v3006_v17  ;;  %v2076_v31 = vmax.f32 %v1983_v18, 0.0  ;;  %v2078_v32 = vmax.f32 %v2060_v19, 0.0 }
 0x44f   : > { %v2085_v17 = vlaneseq }
 0x450   : > { %v2077_v29 = vmax.f32 %v1985_v25, 0.0  ;;  %v2079_v30 = vmax.f32 %v2062_v26, 0.0 }
 0x451   : > { %v2086_v24 = vshrl.u32 %v2085_v17, 7 }
 0x452   : > { %2262 = vmatprep.subr.mxu0 %v2077_v29  ;;  %2333 = vmatprep.subr.mxu1 %v2079_v30 }
 0x453   : > { %2263 = vmatpush1.msra.mxu0 %v2076_v31  ;;  %2334 = vmatpush1.msra.mxu1 %v2078_v32  ;;  %v2087_v36 = vsub.s32 0, %v2086_v24  ;;  %v2393_v50 = vsub.s32 %v2390_v45, %v2086_v24 }
 0x454   : > { %2264 = vmatprep.subr.mxu0 %v2069_v33  ;;  %2335 = vmatprep.subr.mxu1 %v2071_v34 }
 0x455   : > { %2265 = vmatpush1.msra.mxu0 %v2068_v1  ;;  %2336 = vmatpush1.msra.mxu1 %v2070_v35  ;;  %v2088_v42 = vrot.slane %v2083_v37, %v2087_v36 }
 0x456   : > { %2579 = vmatmul.mubr.msk.f32.vlgmr.msra.gmra.mxu0 %vm761_vm2, %v383_v14  ;;  %2580 = vmatmul.mubr.msk.f32.vlgmr.msra.gmra.mxu1 %vm761_vm2, %v383_v14 }
 0x50c   : > { %v2158_v40 = vpop.f32.mrf.mxu0  ;;  %v2229_v41 = vpop.f32.mrf.mxu1 }
 0x50d   : > { %v2159_v48 = vadd.f32 %v2158_v40, %v2088_v42  ;;  %v2230_v49 = vadd.f32 %v2229_v41, %v2088_v42 }
 0x50e   : > { %v2160_v43 = vpop.f32.mrf.mxu0  ;;  %v2231_v44 = vpop.f32.mrf.mxu1 }
 0x50f   : > { %v2161_v46 = vadd.f32 %v2160_v43, %v2088_v42  ;;  %v2232_v47 = vadd.f32 %v2231_v44, %v2088_v42 }
 0x511   : > { %v2384_v51 = vcombine.low %v2159_v48, %v2161_v46  ;;  %v2385_v52 = vcombine.low %v2230_v49, %v2232_v47 }
 0x513   : > { %v2394_v54 = vrot.slane %v2384_v51, %v2393_v50  ;;  %v2401_v55 = vrot.slane %v2385_v52, %v2393_v50 }
 0x515   : > { %v2416_v0 = vcombine.low %v2394_v54, %v2401_v55 }
 0x516   : > { %v2300_v53 = vpop.f32.mrf.mxu0  ;;  %v2371_v60 = vpop.f32.mrf.mxu1 }
 0x517   : > { %v2301_v58 = vadd.f32 %v2300_v53, %v2088_v42  ;;  %v2372_v6 = vadd.f32 %v2371_v60, %v2088_v42  ;;  %v2424_v5 = vrot.slane %v2416_v0, %v2393_v50 }
 0x518   : > { %v2302_v56 = vpop.f32.mrf.mxu0  ;;  %v2373_v57 = vpop.f32.mrf.mxu1 }
 0x519   : > { %v2303_v59 = vadd.f32 %v2302_v56, %v2088_v42  ;;  %v2374_v61 = vadd.f32 %v2373_v57, %v2088_v42 }
 0x51b   : > { %v2386_v62 = vcombine.low %v2301_v58, %v2303_v59  ;;  %v2387_v63 = vcombine.low %v2372_v6, %v2374_v61 }
 0x51d   : > { %v2408_v2 = vrot.slane %v2386_v62, %v2393_v50  ;;  %v2415_v3 = vrot.slane %v2387_v63, %v2393_v50 }
 0x51f   : > { %v2417_v4 = vcombine.low %v2408_v2, %v2415_v3 }
 0x521   : > { %v2431_v7 = vrot.slane %v2417_v4, %v2393_v50 }
 0x523   : > { %v2432_v8 = vcombine.low %v2424_v5, %v2431_v7 }
 0x525   : > { %2434 = vst [vmem:[%s352_s10] sm:$0xff] %v2432_v8 }
 0x526   : > { %2683 = shalt.err (!%p2680_p10)
}
 0x527   : > { %s2684_s28 = scalar_lea.hbm %s2448_s25, 128  ;;  %s2688_s21 = scalar_lea.hbm %s3182_s9, 256 }
 0x528   : > { %p2685_p1 = scmp.ne.s32.totalorder %s2448_s25, %s2684_s28  ;;  %p2689_p0 = scmp.lt.s32.totalorder %s2448_s25, %s3182_s9 }
 0x529   : > { %p2690_p2 = scmp.lt.s32.totalorder %s2688_s21, %s2684_s28 }
 0x52a   : > { %p2686_p3 = pnand %p2685_p1, %p3193_p12 }
 0x52b   : > { %p2691_p6 = por %p2690_p2, %p2689_p0 }
 0x52c   : > { %p2687_p9 = pneg %p2686_p3 }
 0x52e   : > { %p2692_p11 = pnand %p2691_p6, %p2687_p9 }
 0x530   : > { %2695 = shalt.err (!%p2692_p11)
}
 0x531   : > { %2590 = dma.vmem_to_hbm [thread:$0]  (%p3193_p12), %s2451_s15, 128, %s2448_s25, %s2436_s18  }
 0x532 PF: > { %s2462_s17 = sand.u32 1, %s2722_s11   ;;  %p3194_p13 = scmp.ne.s32.totalorder %s3189_s23, 0 }
 0x533   : > { %p3195_p4 = scmp.ge.s32.totalorder %s2734_s14, 2  ;;  %s2463_s30 = scalar_lea.sflag [#allocation5], %s2462_s17 }
 0x535   : > { %p2597_p5 = pnand %p3195_p4, %p3194_p13 }
 0x537   : > { %p2598_p7 = pneg %p2597_p5 }
 0x539   : > { %2717 = dma.done.wait (%p2598_p7), %s2463_s30, 128  }
 0x53a   : > { %2719 = vsyncadd (%p2598_p7), %s2463_s30, 4294967168  ;;  %s3196_s26 = sld [smem:[#allocation9_spill]]  ;;  %p24_p8 = scmp.ge.s32.totalorder %s2822_s16, 4  }
 0x53b   : > { %s3197_s11 = smov %s2726_s12  ;;  %s3198_s12 = smov %s2730_s13 }
 0x53c   : > { %s3200_s14 = smov %s2822_s16  ;;  %26 = sbr.rel (!%p24_p8) target bundleno = 8 (0x8), region = 101 }
 0x540   : > { %s3199_s13 = smov %s3196_s26 }
 0x541   :  { %2468 = vsyncpa [#allocation4], 1 }
 0x542   :  { %2470 = vsyncpa [#allocation4 + $0x1], 1 }
 0x543   :  { %2471 = vsyncpa [#allocation5], 1 }
 0x544   :  { %2473 = vsyncpa [#allocation5 + $0x1], 1 }

</bundles_post_ra>
